<compile_context>
chip_gen: v6e
topology: v6e:2x2x1
jax: 0.10.0
libtpu: 0.0.40
codegen_flags: <defaults>
</compile_context>

<pallas_src>
import functools

import jax
import jax.numpy as jnp
from jax import lax
from jax.experimental import pallas as pl
from jax.experimental.pallas import tpu as pltpu


def _round_up(x: int, m: int) -> int:
    return (x + m - 1) // m * m


def _patch_embed_kernel(x_ref, w_ref, b_ref, o_ref):
    # One MXU matmul per (tm, K) row tile: bf16 operands, f32 accumulation.
    # Weight is in its native (E, K) layout; contract both operands' last
    # dims (same pattern as Q @ K^T) so no (K, E) transpose exists in HBM.
    acc = lax.dot_general(
        x_ref[...], w_ref[...],
        dimension_numbers=(((1,), (1,)), ((), ())),
        preferred_element_type=jnp.float32)
    o_ref[...] = (acc + b_ref[...]).astype(o_ref.dtype)


def patch_embed_forward(x, weight, bias, patch_size, flatten=True, *,
                        tm_max=1024, compute_dtype=jnp.bfloat16,
                        out_dtype=None):
    """x: [B, C, H, W] (NCHW). weight: [E, C, ph, pw]. bias: [E].

    Output dtype defaults to compute_dtype (bf16), halving the dominant HBM
    write stream; pass out_dtype=jnp.float32 if the downstream consumer needs
    f32 (values still use bf16 operands with f32 accumulation either way).
    """
    if out_dtype is None:
        out_dtype = compute_dtype

    B, C, H, W = x.shape
    E = weight.shape[0]
    ph = pw = patch_size
    Gh, Gw = H // ph, W // pw
    num_patches = Gh * Gw

    M = B * num_patches
    K = C * ph * pw

    # ---- glue: bf16 cast + patch extraction --------------------------------
    # allow_input_fusion below lets XLA fuse this producer into the kernel's
    # input DMA instead of materializing xm in HBM (and there is no jnp.pad,
    # so no additional pass over X either).
    # TODO(synk): a 5-D BlockSpec over x.reshape(B, C, Gh, ph, W) with an
    # in-VMEM reshuffle would remove the rearrange entirely; kept as a fused
    # XLA producer for robustness across Mosaic versions.
    xm = (x.astype(compute_dtype)
            .reshape(B, C, Gh, ph, Gw, pw)
            .transpose(0, 2, 4, 1, 3, 5)
            .reshape(M, K))
    wm = weight.astype(compute_dtype).reshape(E, K)   # native (E, K): no transpose copy
    bm = bias.astype(jnp.float32).reshape(1, E)       # f32 bias add after f32 accum

    itm_in = jnp.dtype(compute_dtype).itemsize
    itm_out = jnp.dtype(out_dtype).itemsize

    # ---- generation-aware tile sizing (no HBM padding of X / output) -------
    try:
        vmem_phys = int(pltpu.get_tpu_info().vmem_capacity_bytes)
    except Exception:
        vmem_phys = 64 << 20                  # conservative (v7x-sized) fallback
    budget = (vmem_phys * 3) // 4             # 96 MiB on v5e/v6e, 48 MiB on v7x

    resident = 2 * E * K * itm_in + 2 * E * 4           # weight + bias buffers
    per_row = 2 * K * itm_in + 2 * E * itm_out          # dbl-buffered X + O per row
    tm_vmem = max((max(budget - resident, 0) // per_row) // 16 * 16, 16)
    tm_cap = max(min(tm_max, tm_vmem), 16)

    n_steps = pl.cdiv(M, tm_cap)
    if M >= 32:
        n_steps = max(n_steps, 2)             # >=2 grid steps: both v7x TCs busy
    tm = min(_round_up(pl.cdiv(M, n_steps), 16), tm_cap)   # bf16 sublane packing
    if tm >= M:
        tm = _round_up(M, 8)                  # degenerate: one block covers all rows

    grid = (pl.cdiv(M, tm),)                  # overhang rows are masked by Pallas
                                              # (safe: rows independent, no K grid axis)

    # ---- VMEM limit: generation-aware cap, never below the actual need -----
    vmem_need = 2 * tm * K * itm_in + 2 * tm * E * itm_out + resident
    vmem_limit = int(min(budget, max(2 * vmem_need, 32 << 20)))
    vmem_limit = int(max(vmem_limit, vmem_need + (4 << 20)))

    cost = pl.CostEstimate(
        flops=2 * M * K * E,
        transcendentals=0,
        bytes_accessed=(M * K * itm_in + E * K * itm_in
                        + M * E * itm_out + E * 4),
    )

    # TODO(synk): pipeline_mode=pl.Buffered(1) on the resident weight/bias specs
    # would halve their VMEM footprint; left at default buffering for robustness
    # (the budget above already counts both buffers).
    out = pl.pallas_call(
        _patch_embed_kernel,
        out_shape=jax.ShapeDtypeStruct((M, E), out_dtype),
        grid=grid,
        in_specs=[
            pl.BlockSpec((tm, K), lambda i: (i, 0)),     # X row tile (full K)
            pl.BlockSpec((E, K), lambda i: (0, 0)),      # resident weight
            pl.BlockSpec((1, E), lambda i: (0, 0)),      # resident bias
        ],
        out_specs=pl.BlockSpec((tm, E), lambda i: (i, 0)),
        compiler_params=pltpu.CompilerParams(
            dimension_semantics=("parallel",),           # shard M over TCs
            vmem_limit_bytes=vmem_limit,
            allow_input_fusion=[True, False, False],     # fuse patch extraction
        ),
        cost_estimate=cost,
    )(xm, wm, bm)

    out = out.reshape(B, num_patches, E)                 # metadata-only, no slice
    if flatten:
        return out                                       # [B, num_patches, E]
    # un-flattened path: [B, E, Gh, Gw] (NCHW conv output)
    return out.reshape(B, Gh, Gw, E).transpose(0, 3, 1, 2)


if __name__ == "__main__":
    # Small deterministic example: resolution=16, patch=4, C=4, E=32, B=2.
    B, C, RES, PATCH, EMBED = 2, 4, 16, 4, 32

    key = jax.random.PRNGKey(0)
    kx, kw, kb = jax.random.split(key, 3)

    x = jax.random.normal(kx, (B, C, RES, RES), dtype=jnp.float32)
    fan_in = C * PATCH * PATCH
    bound = 1.0 / (fan_in ** 0.5)
    weight = jax.random.uniform(kw, (EMBED, C, PATCH, PATCH),
                                minval=-bound, maxval=bound, dtype=jnp.float32)
    bias = jax.random.uniform(kb, (EMBED,), minval=-bound, maxval=bound,
                              dtype=jnp.float32)

    fwd = jax.jit(functools.partial(patch_embed_forward,
                                    patch_size=PATCH, flatten=True))
    out = jax.block_until_ready(fwd(x, weight, bias))

    # Also exercise the un-flattened path (shape check only).
    out_nchw = jax.block_until_ready(
        patch_embed_forward(x, weight, bias, PATCH, flatten=False))
    assert out_nchw.shape == (B, EMBED, RES // PATCH, RES // PATCH)

    # Reference: same conv-as-matmul math with bf16 operands / f32 accumulation,
    # kept in f32 (kernel output is bf16 by default -> compare with tolerance).
    Gh = Gw = RES // PATCH
    xp = x.astype(jnp.bfloat16).reshape(B, C, Gh, PATCH, Gw, PATCH)
    xp = xp.transpose(0, 2, 4, 1, 3, 5).reshape(B * Gh * Gw, C * PATCH * PATCH)
    wr = weight.astype(jnp.bfloat16).reshape(EMBED, -1)
    ref = (jnp.dot(xp, wr.T, preferred_element_type=jnp.float32)
           + bias.astype(jnp.float32)).reshape(B, Gh * Gw, EMBED)

    assert out.shape == (B, Gh * Gw, EMBED)
    assert out.dtype == jnp.bfloat16
    assert jnp.allclose(out.astype(jnp.float32), ref, atol=2e-2, rtol=2e-2)

    print("KERNEL_OK")
</pallas_src>

<mosaic_0001>
module attributes {stable_mosaic.version = 11 : i64} {
  func.func @_patch_embed_kernel(%arg0: i32, %arg1: memref<16x64xbf16, #tpu.memory_space<vmem>>, %arg2: memref<32x64xbf16, #tpu.memory_space<vmem>>, %arg3: memref<1x32xf32, #tpu.memory_space<vmem>>, %arg4: memref<16x32xbf16, #tpu.memory_space<vmem>>) attributes {dimension_semantics = [#tpu.dimension_semantics<parallel>], iteration_bounds = array<i64: 2>, scalar_prefetch = 0 : i64, scratch_operands = 0 : i64, tpu.core_type = #tpu.core_type<tc>, window_params = [{transform_indices = @transform_0, window_bounds = array<i64: 16, 64>}, {pipeline_mode = #tpu.pipeline_mode<synchronous>, transform_indices = @transform_1, window_bounds = array<i64: 32, 64>}, {pipeline_mode = #tpu.pipeline_mode<synchronous>, transform_indices = @transform_2, window_bounds = array<i64: 1, 32>}, {transform_indices = @transform_3, window_bounds = array<i64: 16, 32>}]} {
    %c0 = arith.constant 0 : index
    %c0_0 = arith.constant 0 : index
    %0 = vector.load %arg1[%c0, %c0_0] : memref<16x64xbf16, #tpu.memory_space<vmem>>, vector<16x64xbf16>
    %c0_1 = arith.constant 0 : index
    %c0_2 = arith.constant 0 : index
    %1 = vector.load %arg2[%c0_1, %c0_2] : memref<32x64xbf16, #tpu.memory_space<vmem>>, vector<32x64xbf16>
    %cst = arith.constant dense<0.000000e+00> : vector<16x32xf32>
    %2 = tpu.matmul %0, %1, %cst {dimension_numbers = #tpu.dot_dimension_numbers<[1], [1], [0], [0], [0, 0, 1, 0], [], []>} : vector<16x64xbf16>, vector<32x64xbf16>, vector<16x32xf32> -> vector<16x32xf32>
    %c0_3 = arith.constant 0 : index
    %c0_4 = arith.constant 0 : index
    %3 = vector.load %arg3[%c0_3, %c0_4] : memref<1x32xf32, #tpu.memory_space<vmem>>, vector<1x32xf32>
    %4 = vector.broadcast %3 : vector<1x32xf32> to vector<16x32xf32>
    %5 = arith.addf %2, %4 : vector<16x32xf32>
    %6 = arith.truncf %5 : vector<16x32xf32> to vector<16x32xbf16>
    %c0_5 = arith.constant 0 : index
    %c0_6 = arith.constant 0 : index
    %7 = vector.load %arg4[%c0_5, %c0_6] : memref<16x32xbf16, #tpu.memory_space<vmem>>, vector<16x32xbf16>
    tpu.vector_store %arg4[%c0_5, %c0_6], %6 {strides = array<i32>} : memref<16x32xbf16, #tpu.memory_space<vmem>>, vector<16x32xbf16>,
    return
  }
  func.func @transform_0(%arg0: i32) -> (i32, i32) {
    %c0_i32 = arith.constant 0 : i32
    %c0_i32_0 = arith.constant 0 : i32
    return %arg0, %c0_i32 : i32, i32
  }
  func.func @transform_1(%arg0: i32) -> (i32, i32) {
    %c0_i32 = arith.constant 0 : i32
    %c0_i32_0 = arith.constant 0 : i32
    %c0_i32_1 = arith.constant 0 : i32
    return %c0_i32, %c0_i32_0 : i32, i32
  }
  func.func @transform_2(%arg0: i32) -> (i32, i32) {
    %c0_i32 = arith.constant 0 : i32
    %c0_i32_0 = arith.constant 0 : i32
    %c0_i32_1 = arith.constant 0 : i32
    return %c0_i32, %c0_i32_0 : i32, i32
  }
  func.func @transform_3(%arg0: i32) -> (i32, i32) {
    %c0_i32 = arith.constant 0 : i32
    %c0_i32_0 = arith.constant 0 : i32
    return %arg0, %c0_i32 : i32, i32
  }
}

</mosaic_0001>

<bundles_post_ra>
// kernel: patch_embed_forward.1
= control target key start
LH: loop header
LB: loop body
LE: loop exit
PB: predicated region body
PF: predicated region fallthrough
CT: control target
= control target key end

     0   :  { %8 = vsyncpa [#allocation3], 0  ;;  %s615_s0 = inlined_call_operand.vmem [shape: bf16[32,64], index: 0, kind: input, shape index: {}]   ;;  %s616_s1 = inlined_call_operand.vmem [shape: bf16[32,64], index: 1, kind: input, shape index: {}]   ;;  %s617_s2 = inlined_call_operand.vmem [shape: f32[1,32], index: 2, kind: input, shape index: {}]   ;;  %s618_s3 = inlined_call_operand.hbm [shape: bf16[32,32], index: 3, kind: output, shape index: {}]  }
   0x1   :  { %10 = vsyncpa [#allocation3 + $0x1], 0  ;;  %s505_s12 = smov 0   ;;  %s507_s13 = smov 0  }
   0x2   :  { %s509_s14 = smov 0   ;;  %s511_s15 = smov 0  }
   0x3 LB: > { %s526_s16 = sadd.s32 4294967295, %s478_s15   ;;  %s339_s17 = sadd.s32 4294967294, %s478_s15   ;;  %s478_s15 = sphi %s511_s15, %s624_s15   ;;  %s474_s14 = sphi %s509_s14, %s623_s14   ;;  %s470_s13 = sphi %s507_s13, %s622_s13   ;;  %s466_s12 = sphi %s505_s12, %s621_s12  }
   0x4   : > { %s530_s18 = sadd.s32 1, %s478_s15   ;;  %s91_s19 = sadd.s32 1, %s474_s14 }
   0x5   : > { %s88_s20 = ssub.s32 %s478_s15, %s530_s18  ;;  %p101_p0 = scmp.ne.s32.totalorder %s474_s14, %s470_s13 }
   0x6   : > { %p89_p1 = scmp.eq.s32.totalorder %s88_s20, 0  ;;  %p102_p2 = scmp.eq.s32.totalorder %s526_s16, 1 }
   0x7   : > { %p107_p3 = scmp.ne.s32.totalorder %s470_s13, %s466_s12  ;;  %p108_p4 = scmp.eq.s32.totalorder %s339_s17, 1 }
   0x8   : > { %s541_s21 = scalar_select %p89_p1, %s474_s14, %s91_s19  }
   0x9   : > { %p543_p5 = por %p102_p2, %p101_p0  ;;  %p547_p6 = por %p108_p4, %p107_p3 }
   0xa   : > { %p342_p7 = scmp.ge.s32.totalorder %s478_s15, 1  ;;  %p141_p8 = scmp.lt.s32.totalorder %s478_s15, 3 }
   0xc   : > { %p142_p9 = pnand %p342_p7, %p141_p8 }
   0xd   : > { %s344_s26 = sshll.u32 (!%p142_p9), %s526_s16, 1  ;;  %s162_s6 = sand.u32 (!%p142_p9), 1, %s470_s13  }
   0xe   : > { %145 = sbr.rel (%p142_p9) target bundleno = 251 (0xfb), region = 32  ;;  %p166_p10 = scmp.lt.s32.totalorder (!%p142_p9), %s344_s26, 3 }
   0xf   : > { %s343_s9 = sshll.u32 (!%p142_p9), %s162_s6, 3  ;;  %s360_s17 = sshll.u32 (!%p142_p9), %s526_s16, 7 }
  0x10   : > { %s164_s10 = scalar_lea.vmem (!%p142_p9), [#allocation2], %s343_s9  ;;  %s573_s24 = scalar_lea.hbm (!%p142_p9), %s618_s3, %s360_s17 }
  0x11   : > { %s277_s11 = sshll.u32 (!%p142_p9), %s164_s10, 4  ;;  %s575_s25 = scalar_lea.sflag (!%p142_p9), [#allocation3], %s162_s6  ;;  %s568_s11 = int_to_ptr.vmem [resolvable:$true] %s277_s11 }
  0x12   : > { %s482_s16 = smov (!%p142_p9), [#allocation2]  }
  0x13   : > { %v415_v0 = vld [vmem:[%s616_s1 + $0x8] sm:$0xff]   ;;  %v480_v1 = vmov 0.0   ;;  %vm201_vm0 = vcmask 523264   ;;  %vm481_vm1 = vmmov 0   ;;  %v416_v3 = vld [vmem:[%s616_s1] sm:$0xff]   ;;  %s626_s26 = smov (!%p166_p10, %s344_s26), 3 }
  0x14   : > { %364 = vmatprep.subr.bf16.mxu0 %v480_v1  ;;  %v209_v2 = vsel %vm201_vm0, %v415_v0, 0  ;;  %368 = vmatprep.mubr.msk.bf16.mxu0 %vm481_vm1, %v480_v1  ;;  %s345_s29 = sshll.u32 %s626_s26, 2  ;;  %v206_v4 = vsel %vm201_vm0, %v416_v3, 0  ;;  %v346_v6 = vld [vmem:[%s617_s2] ss:$0 sm:$0xff]  ;;  %vm260_vm2 = vcmask 257024  }
  0x15   : > { %365 = vmatpush3.bf16.xpose.msra.mxu0 %v209_v2  ;;  %s169_s5 = scalar_lea.vmem %s615_s0, %s345_s29  ;;  %s418_s26 = scalar_lea.vmem %s568_s11, 128 }
  0x16   : > { %366 = vmatprep.subr.bf16.mxu0 %v480_v1  ;;  %v417_v5 = vld [vmem:[%s169_s5] sm:$0xff]   ;;  %p419_p11 = scmp.ne.s32.totalorder %s568_s11, %s418_s26  ;;  %s422_s27 = sshll.u32 %s482_s16, 4  ;;  %s423_s27 = int_to_ptr.vmem [resolvable:$false] %s422_s27 }
  0x17   : > { %s424_s28 = scalar_lea.vmem %s423_s27, 256  ;;  %p425_p0 = scmp.lt.s32.totalorder %s568_s11, %s423_s27 }
  0x18   : > { %p420_p12 = pnand %p419_p11, %p543_p5  ;;  %p426_p1 = scmp.lt.s32.totalorder %s424_s28, %s418_s26 }
  0x1a   : > { %p421_p13 = pneg %p420_p12  ;;  %p427_p2 = por %p426_p1, %p425_p0 }
  0x1c   : > { %p428_p3 = pnand %p427_p2, %p421_p13 }
  0x1d   : > { %367 = vmatpush3.bf16.xpose.msra.mxu0 %v206_v4 }
  0x24   : > { %369 = vmatmul.mubr.msk.bf16.vlgmr.msra.gmra.mxu0 %vm201_vm0, %v417_v5 }
  0xe4   : > { %v245_v7 = vpop.f32.mrf.mxu0 }
  0xe5   : > { %v246_v8 = vadd.f32 %v346_v6, %v245_v7 }
  0xe6   : > { %v370_v9 = vpop.f32.mrf.mxu0 }
  0xe7   : > { %v358_v10 = vpack.c.bf16 %v246_v8, %v246_v8 }
  0xe8   : > { %v248_v11 = vpop.f32.mrf.mxu0 }
  0xe9   : > { %261 = vst.msk [vmem:[%s164_s10] sm:$0xf] %vm260_vm2, %v358_v10  ;;  %v249_v12 = vadd.f32 %v346_v6, %v248_v11 }
  0xea   : > { %v371_v13 = vpop.f32.mrf.mxu0 }
  0xeb   : > { %v359_v14 = vpack.c.bf16 %v249_v12, %v249_v12 }
  0xed   : > { %262 = vst.msk [vmem:[%s164_s10 + $0x4] sm:$0xf] %vm260_vm2, %v359_v14 }
  0xee   : > { %431 = shalt.err (!%p428_p3)
}
  0xef   : > { %s432_s29 = scalar_lea.hbm %s573_s24, 128  ;;  %s436_s5 = scalar_lea.hbm %s618_s3, 256 }
  0xf0   : > { %p433_p4 = scmp.ne.s32.totalorder %s573_s24, %s432_s29  ;;  %p437_p9 = scmp.lt.s32.totalorder %s573_s24, %s618_s3 }
  0xf1   : > { %p438_p10 = scmp.lt.s32.totalorder %s436_s5, %s432_s29 }
  0xf2   : > { %p434_p7 = pnand %p433_p4, %p543_p5 }
  0xf3   : > { %p439_p11 = por %p438_p10, %p437_p9 }
  0xf4   : > { %p435_p8 = pneg %p434_p7 }
  0xf6   : > { %p440_p12 = pnand %p439_p11, %p435_p8 }
  0xf8   : > { %443 = shalt.err (!%p440_p12)
}
  0xf9   : > { %s483_s8 = smov 64   ;;  %s484_s9 = smov 4  }
  0xfa   : > { %372 = dma.vmem_to_hbm [thread:$0]  (%p543_p5), %s568_s11, 128, %s573_s24, %s575_s25, %s483_s8, %s483_s8, %s484_s9  }
  0xfb PF: > { %p378_p13 = scmp.ge.s32.totalorder %s478_s15, 2  ;;  %s292_s10 = sand.u32 1, %s466_s12  }
  0xfc   : > { %s293_s17 = scalar_lea.sflag [#allocation3], %s292_s10 }
  0xfd   : > { %p375_p0 = pnand %p378_p13, %p547_p6 }
  0xff   : > { %p376_p1 = pneg %p375_p0 }
 0x101   : > { %461 = dma.done.wait (%p376_p1), %s293_s17, 128  }
 0x102   : > { %463 = vsyncadd (%p376_p1), %s293_s17, 4294967168  ;;  %p13_p2 = scmp.ge.s32.totalorder %s530_s18, 4   ;;  %s621_s12 = smov %s470_s13 }
 0x103   : > { %s622_s13 = smov %s474_s14  ;;  %s623_s14 = smov %s541_s21 }
 0x104   : > { %s624_s15 = smov %s530_s18  ;;  %15 = sbr.rel (!%p13_p2) target bundleno = 3 (0x3), region = 67 }
 0x109   :  { %298 = vsyncpa [#allocation3], 1 }
 0x10a   :  { %300 = vsyncpa [#allocation3 + $0x1], 1 }

</bundles_post_ra>
